<compile_context>
chip_gen: v6e
topology: v6e:2x2x1
jax: 0.10.0
libtpu: 0.0.40
codegen_flags: <defaults>
</compile_context>

<pallas_src>
import math

import jax
import jax.numpy as jnp
from jax.experimental import pallas as pl
from jax.experimental.pallas import tpu as pltpu

_LANE = 128
_MAX_LANES = 1024                 # lane width of the flattened slab
_TARGET_BLOCK_BYTES = 2 << 20     # ~2 MiB per block (x2 buffers x in/out < 8 MiB VMEM)


def _scale_kernel(x_ref, o_ref):
    # Elementwise hot path on the VPU.
    o_ref[...] = x_ref[...] * 0.5


def _pick_layout(total_elems, itemsize):
    """Pick a lane-dense (rows, lanes) flatten and a row tile for pipelining.

    Returns (rows, lanes, tile_r) or None if no multiple-of-128 flatten exists.
    tile_r always divides rows exactly and is either == rows (single block) or
    a multiple of 8 (satisfies the (8, 128) block-shape rule).
    """
    if total_elems % _LANE != 0:
        return None
    lanes = _LANE
    while lanes * 2 <= _MAX_LANES and total_elems % (lanes * 2) == 0:
        lanes *= 2
    rows = total_elems // lanes
    target_rows = max(8, _TARGET_BLOCK_BYTES // (lanes * itemsize))
    if rows <= target_rows:
        tile_r = rows                      # whole slab fits in one ~2 MiB block
    else:
        tile_r = rows                      # fallback: single (larger) block
        for cand in (1024, 512, 256, 128, 64, 32, 16, 8):
            if cand <= target_rows and rows % cand == 0:
                tile_r = cand
                break
    return rows, lanes, tile_r


@jax.jit
def test_model_forward(x):
    """Pallas equivalent of TestModel.forward: return x * 0.5 (same shape/dtype)."""
    orig_shape = x.shape
    total = math.prod(orig_shape)
    itemsize = jnp.dtype(x.dtype).itemsize

    layout = _pick_layout(total, itemsize)
    if layout is None:
        # Fallback layout: trailing dim on lanes, single full-extent block
        # (block_shape == array shape, so the (8,128) rule does not apply).
        x2d = x.reshape(-1, orig_shape[-1])
        rows, lanes = x2d.shape
        tile_r = rows
    else:
        rows, lanes, tile_r = layout
        x2d = x.reshape(rows, lanes)       # glue reshape, no semantic change

    grid = (rows // tile_r,)

    out2d = pl.pallas_call(
        _scale_kernel,
        out_shape=jax.ShapeDtypeStruct((rows, lanes), x.dtype),
        grid_spec=pl.GridSpec(
            grid=grid,
            in_specs=[pl.BlockSpec((tile_r, lanes), lambda i: (i, 0))],
            out_specs=pl.BlockSpec((tile_r, lanes), lambda i: (i, 0)),
        ),
        # Tiles are fully independent: let megacore (v7x: 2 TCs) shard the
        # grid; harmless no-op on single-core v5e/v6e.
        compiler_params=pltpu.CompilerParams(
            dimension_semantics=("parallel",),
        ),
        # Reuse the input's HBM allocation for the output when possible.
        input_output_aliases={0: 0},
    )(x2d)

    return out2d.reshape(orig_shape)


if __name__ == "__main__":
    key = jax.random.PRNGKey(0)

    # Small shape consistent with the module spec (N, C, H, W).
    x = jax.random.normal(key, (2, 4, 16, 16), dtype=jnp.float32)
    expected = x * 0.5                      # reference computed before the call
    y = test_model_forward(x)
    jax.block_until_ready(y)
    assert y.shape == x.shape and y.dtype == x.dtype
    assert jnp.allclose(y, expected, atol=0, rtol=0)

    # Slightly larger input to exercise the multi-block, pipelined path
    # (rows=2048, lanes=1024, tile_r=512 -> grid=(4,)).
    x_big = jax.random.normal(jax.random.PRNGKey(1), (8, 16, 128, 128),
                              dtype=jnp.float32)
    expected_big = x_big * 0.5
    y_big = test_model_forward(x_big)
    jax.block_until_ready(y_big)
    assert jnp.allclose(y_big, expected_big, atol=0, rtol=0)

    print("KERNEL_OK")
</pallas_src>

<mosaic_0001>
module attributes {stable_mosaic.version = 11 : i64} {
  func.func @_scale_kernel(%arg0: i32, %arg1: memref<2x1024xf32, #tpu.memory_space<vmem>>, %arg2: memref<2x1024xf32, #tpu.memory_space<vmem>>) attributes {dimension_semantics = [#tpu.dimension_semantics<parallel>], iteration_bounds = array<i64: 1>, scalar_prefetch = 0 : i64, scratch_operands = 0 : i64, tpu.core_type = #tpu.core_type<tc>, window_params = [{transform_indices = @transform_0, window_bounds = array<i64: 2, 1024>}, {transform_indices = @transform_1, window_bounds = array<i64: 2, 1024>}]} {
    %c0 = arith.constant 0 : index
    %c0_0 = arith.constant 0 : index
    %0 = vector.load %arg1[%c0, %c0_0] : memref<2x1024xf32, #tpu.memory_space<vmem>>, vector<2x1024xf32>
    %cst = arith.constant 5.000000e-01 : f32
    %1 = vector.broadcast %cst : f32 to vector<2x1024xf32>
    %2 = arith.mulf %0, %1 : vector<2x1024xf32>
    %c0_1 = arith.constant 0 : index
    %c0_2 = arith.constant 0 : index
    %3 = vector.load %arg2[%c0_1, %c0_2] : memref<2x1024xf32, #tpu.memory_space<vmem>>, vector<2x1024xf32>
    tpu.vector_store %arg2[%c0_1, %c0_2], %2 {strides = array<i32>} : memref<2x1024xf32, #tpu.memory_space<vmem>>, vector<2x1024xf32>,
    return
  }
  func.func @transform_0(%arg0: i32) -> (i32, i32) {
    %c0_i32 = arith.constant 0 : i32
    %c0_i32_0 = arith.constant 0 : i32
    return %arg0, %c0_i32 : i32, i32
  }
  func.func @transform_1(%arg0: i32) -> (i32, i32) {
    %c0_i32 = arith.constant 0 : i32
    %c0_i32_0 = arith.constant 0 : i32
    return %arg0, %c0_i32 : i32, i32
  }
}

</mosaic_0001>

<bundles_post_ra>
// kernel: test_model_forward.1
= control target key start
LH: loop header
LB: loop body
LE: loop exit
PB: predicated region body
PF: predicated region fallthrough
CT: control target
= control target key end

     0   :  { %s40_s0 = inlined_call_operand.vmem [shape: f32[2,1024], index: 0, kind: input, shape index: {}, may-alias: {0,1}]   ;;  %s41_s1 = inlined_call_operand.vmem [shape: f32[2,1024], index: 1, kind: output, shape index: {}, may-alias: {0,1}]  }
   0x1   :  { %v8_v0 = vld [vmem:[%s40_s0] sm:$0xff]  ;;  %v9_v1 = vld [vmem:[%s40_s0 + $0x8] sm:$0xff] }
   0x2   :  { %v10_v2 = vmul.f32 0.5, %v8_v0  ;;  %v11_v3 = vmul.f32 0.5, %v9_v1 }
   0x4   :  { %12 = vst [vmem:[%s41_s1] sm:$0xff] %v10_v2  ;;  %13 = vst [vmem:[%s41_s1 + $0x8] sm:$0xff] %v11_v3 }

</bundles_post_ra>
